<compile_context>
chip_gen: v7x
topology: tpu7x:2x2x1
jax: 0.10.0
libtpu: 0.0.40
codegen_flags: <defaults>
</compile_context>

<pallas_src>
import functools

import jax
import jax.numpy as jnp
from jax import lax
from jax.experimental import pallas as pl
from jax.experimental.pallas import tpu as pltpu


def _head_kernel(x_ref, w_ref, o_ref, *, hp, collapse):
    # x_ref: (bb, T, C) f32, w_ref: (C, 3*hp) bf16, o_ref: (bb, T, hp) f32
    bb, T, C = x_ref.shape

    # Causal mask generated in-kernel (row = query index, col = key index).
    row = lax.broadcasted_iota(jnp.int32, (T, T), 0)
    col = lax.broadcasted_iota(jnp.int32, (T, T), 1)
    causal = row >= col

    # x arrives f32; cast to bf16 here (saves a wrapper-side HBM convert pass).
    xb = x_ref[...].astype(jnp.bfloat16)

    if collapse:
        # T % 16 == 0: collapsing the batch block into rows is a layout no-op,
        # so the three projections run as ONE wide MXU matmul (M=bb*T, N=3*hp).
        # The C**-0.5 scale is already folded into the q columns of w_ref.
        qkv = jnp.dot(xb.reshape(bb * T, C), w_ref[...],
                      preferred_element_type=jnp.float32)
        qkv = qkv.reshape(bb, T, 3 * hp)

        # Static, lane-aligned slices (hp is a multiple of 128).
        qb = qkv[:, :, 0 * hp:1 * hp].astype(jnp.bfloat16)
        kb = qkv[:, :, 1 * hp:2 * hp].astype(jnp.bfloat16)
        vb = qkv[:, :, 2 * hp:3 * hp].astype(jnp.bfloat16)

        # Scores: contract the head dim, no explicit transpose of k.
        s = jnp.einsum("bth,bsh->bts", qb, kb,
                       preferred_element_type=jnp.float32)      # (bb,T,T) f32
        s = jnp.where(causal[None, :, :], s, -jnp.inf)

        # Numerically stable softmax; normalization DEFERRED past the AV
        # matmul so the divide touches (bb,T,hp) instead of (bb,T,T).
        m = jnp.max(s, axis=-1, keepdims=True)
        e = jnp.exp(s - m)                                      # in [0,1], bf16-safe
        denom = jnp.sum(e, axis=-1, keepdims=True)              # (bb,T,1) f32

        # Dropout on attention weights: eval mode -> identity.
        out = jnp.einsum("bts,bsh->bth", e.astype(jnp.bfloat16), vb,
                         preferred_element_type=jnp.float32)    # (bb,T,hp)
        o_ref[...] = (out * pl.reciprocal(denom, approx=True)).astype(o_ref.dtype)
    else:
        # T not sublane-tile aligned: a (bb,T,C)->(bb*T,C) reshape would
        # materialize a VMEM repack, so process batch rows with a short static
        # unroll of 2-D ops instead (bb is capped small on this path).
        for i in range(bb):
            xi = xb[i]                                          # (T, C) bf16
            qkv = jnp.dot(xi, w_ref[...],
                          preferred_element_type=jnp.float32)   # (T, 3*hp) f32
            q = qkv[:, 0 * hp:1 * hp].astype(jnp.bfloat16)
            k = qkv[:, 1 * hp:2 * hp].astype(jnp.bfloat16)
            v = qkv[:, 2 * hp:3 * hp].astype(jnp.bfloat16)

            s = jnp.einsum("th,sh->ts", q, k,
                           preferred_element_type=jnp.float32)  # (T,T) f32
            s = jnp.where(causal, s, -jnp.inf)

            m = jnp.max(s, axis=-1, keepdims=True)
            e = jnp.exp(s - m)
            denom = jnp.sum(e, axis=-1, keepdims=True)

            out = jnp.dot(e.astype(jnp.bfloat16), v,
                          preferred_element_type=jnp.float32)   # (T, hp)
            o_ref[i] = (out * pl.reciprocal(denom, approx=True)).astype(o_ref.dtype)


def _vmem_limit_bytes():
    """Per-generation VMEM budget: ~75% of physical per-core capacity
    (v5e/v6e: 128 MiB -> 96 MiB, v7x: 64 MiB -> 48 MiB)."""
    try:
        cap = int(pltpu.get_tpu_info().vmem_capacity_bytes)
    except Exception:
        cap = 64 * 1024 * 1024   # conservative fallback, safe on all generations
    return cap * 3 // 4


def _pick_block_b(B, T, C, Hp, vmem_budget, collapse):
    """Largest batch block that (a) fits the VMEM budget, (b) leaves >= 2 grid
    steps so both v7x TensorCores get work, (c) bounds static unrolling."""
    per_b = (
        8 * T * C            # double-buffered f32 x block
        + 8 * T * Hp         # double-buffered f32 out block
        + 2 * T * C          # bf16 x copy
        + 12 * T * Hp        # f32 fused qkv
        + 6 * T * Hp         # bf16 q/k/v
        + 4 * T * Hp         # f32 unnormalized out
        + 10 * T * T         # f32 scores + f32 exp + bf16 exp
    )
    fixed = 12 * C * Hp      # fused weight (assume double-buffered)
    cap_vmem = max(1, (vmem_budget - fixed) // per_b)
    cap_cores = max(1, B // 2)                 # keep grid length >= 2
    cap_unroll = 16 if collapse else 8
    cap = max(1, min(cap_vmem, cap_cores, cap_unroll))
    for d in range(min(B, cap), 0, -1):
        if B % d == 0:
            return d
    return 1


def head_forward(x, wk, wq, wv, *, block_b=None):
    """Single-head causal self-attention (eval mode).

    x:            (B, T, C) float32
    wk/wq/wv:     (C, H) float32   (transposed torch Linear weights)
    returns       (B, T, H) float32
    """
    B, T, C = x.shape
    H = wk.shape[1]
    scale = float(C) ** (-0.5)          # PyTorch module scales by C, not H.

    # Pad the head dim up to a lane-dense multiple of 128; zero weight columns
    # produce exactly-zero output columns, which are sliced off below.
    Hp = max(128, ((H + 127) // 128) * 128)
    pad = Hp - H

    def _padw(w):
        return jnp.pad(w, ((0, 0), (0, pad))) if pad else w

    # Fused projection weight: one (C, 3*Hp) bf16 matrix; q columns pre-scaled
    # by C**-0.5 so the kernel does one wide MXU matmul and no scale multiply.
    w_fused = jnp.concatenate(
        [_padw(wq) * scale, _padw(wk), _padw(wv)], axis=1
    ).astype(jnp.bfloat16)

    collapse = (T % 16 == 0)            # bf16 sublane tile -> reshape is free
    vmem_limit = _vmem_limit_bytes()
    bb = block_b if block_b is not None else _pick_block_b(
        B, T, C, Hp, (vmem_limit * 9) // 10, collapse)
    assert B % bb == 0
    grid = (B // bb,)

    cost = pl.CostEstimate(
        flops=2 * B * T * Hp * (3 * C + 2 * T),
        transcendentals=B * T * T,
        bytes_accessed=B * T * C * 4 + C * 3 * Hp * 2 + B * T * Hp * 4,
    )

    def _make_call(weight_spec):
        return pl.pallas_call(
            functools.partial(_head_kernel, hp=Hp, collapse=collapse),
            out_shape=jax.ShapeDtypeStruct((B, T, Hp), jnp.float32),
            grid=grid,
            in_specs=[
                pl.BlockSpec((bb, T, C), lambda b: (b, 0, 0)),   # x (f32)
                weight_spec,                                      # fused W (bf16)
            ],
            out_specs=pl.BlockSpec((bb, T, Hp), lambda b: (b, 0, 0)),
            compiler_params=pltpu.CompilerParams(
                dimension_semantics=("parallel",),
                vmem_limit_bytes=vmem_limit,
            ),
            cost_estimate=cost,
        )

    try:
        # Fused-weight block index never changes across the grid: single-buffer
        # it to reclaim one C x 3*Hp VMEM buffer (matters most on v7x).
        w_spec = pl.BlockSpec((C, 3 * Hp), lambda b: (0, 0),
                              pipeline_mode=pl.Buffered(1))
        out = _make_call(w_spec)(x, w_fused)
    except Exception:
        # pipeline_mode / Buffered(1) unsupported on this jax build: fall back
        # to the default double-buffered weight block (only 6*C*Hp extra bytes).
        out = _make_call(pl.BlockSpec((C, 3 * Hp), lambda b: (0, 0)))(x, w_fused)

    return out[:, :, :H]


def reference_head_bf16(x, wk, wq, wv):
    """Pure-JAX reference mirroring the kernel's precision path."""
    B, T, C = x.shape
    scale = float(C) ** (-0.5)
    f32 = jnp.float32
    xb = x.astype(jnp.bfloat16)
    q = jnp.einsum("btc,ch->bth", xb, (wq * scale).astype(jnp.bfloat16),
                   preferred_element_type=f32).astype(jnp.bfloat16)
    k = jnp.einsum("btc,ch->bth", xb, wk.astype(jnp.bfloat16),
                   preferred_element_type=f32).astype(jnp.bfloat16)
    v = jnp.einsum("btc,ch->bth", xb, wv.astype(jnp.bfloat16),
                   preferred_element_type=f32).astype(jnp.bfloat16)
    s = jnp.einsum("bth,bsh->bts", q, k, preferred_element_type=f32)
    mask = jnp.tril(jnp.ones((T, T), dtype=bool))
    s = jnp.where(mask[None], s, -jnp.inf)
    m = jnp.max(s, axis=-1, keepdims=True)
    e = jnp.exp(s - m)
    denom = jnp.sum(e, axis=-1, keepdims=True)
    out = jnp.einsum("bts,bsh->bth", e.astype(jnp.bfloat16), v,
                     preferred_element_type=f32)
    return out / denom


def reference_head_f32(x, wk, wq, wv):
    """Full-f32 reference of the original PyTorch forward (eval mode)."""
    B, T, C = x.shape
    q, k, v = x @ wq, x @ wk, x @ wv
    s = (q @ jnp.swapaxes(k, -2, -1)) * (float(C) ** -0.5)
    mask = jnp.tril(jnp.ones((T, T), dtype=bool))
    s = jnp.where(mask[None], s, -jnp.inf)
    p = jax.nn.softmax(s, axis=-1)
    return p @ v


if __name__ == "__main__":
    # Small, module-consistent shapes:
    #   batch B=2, sequence T=block_size=8, embedding C=32, head_size H=16
    B, T, C, H = 2, 8, 32, 16

    key = jax.random.PRNGKey(0)
    kx, kk, kq, kv = jax.random.split(key, 4)

    x = jax.random.normal(kx, (B, T, C), dtype=jnp.float32)
    wk = jax.random.normal(kk, (C, H), dtype=jnp.float32) * (1.0 / jnp.sqrt(C))
    wq = jax.random.normal(kq, (C, H), dtype=jnp.float32) * (1.0 / jnp.sqrt(C))
    wv = jax.random.normal(kv, (C, H), dtype=jnp.float32) * (1.0 / jnp.sqrt(C))

    out = head_forward(x, wk, wq, wv)
    out = jax.block_until_ready(out)
    assert out.shape == (B, T, H)

    ref_bf16 = reference_head_bf16(x, wk, wq, wv)
    ref_f32 = reference_head_f32(x, wk, wq, wv)
    assert jnp.allclose(out, ref_bf16, atol=2e-2, rtol=2e-2), "mismatch vs bf16 reference"
    assert jnp.allclose(out, ref_f32, atol=1e-1, rtol=1e-1), "mismatch vs f32 reference"

    print("KERNEL_OK")
</pallas_src>

<mosaic_0001>
module attributes {stable_mosaic.version = 11 : i64} {
  func.func @_head_kernel(%arg0: i32, %arg1: memref<1x8x32xf32, #tpu.memory_space<vmem>>, %arg2: memref<32x384xbf16, #tpu.memory_space<vmem>>, %arg3: memref<1x8x128xf32, #tpu.memory_space<vmem>>) attributes {dimension_semantics = [#tpu.dimension_semantics<parallel>], iteration_bounds = array<i64: 2>, scalar_prefetch = 0 : i64, scratch_operands = 0 : i64, tpu.core_type = #tpu.core_type<tc>, window_params = [{transform_indices = @transform_0, window_bounds = array<i64: 1, 8, 32>}, {pipeline_mode = #tpu.pipeline_mode<synchronous>, transform_indices = @transform_1, window_bounds = array<i64: 32, 384>}, {transform_indices = @transform_2, window_bounds = array<i64: 1, 8, 128>}]} {
    %0 = tpu.iota {dimensions = array<i32: 0>} : vector<8x8xi32>
    %1 = tpu.iota {dimensions = array<i32: 1>} : vector<8x8xi32>
    %2 = arith.cmpi sge, %0, %1 : vector<8x8xi32>
    %c0 = arith.constant 0 : index
    %c0_0 = arith.constant 0 : index
    %c0_1 = arith.constant 0 : index
    %3 = vector.load %arg1[%c0, %c0_0, %c0_1] : memref<1x8x32xf32, #tpu.memory_space<vmem>>, vector<1x8x32xf32>
    %4 = arith.truncf %3 : vector<1x8x32xf32> to vector<1x8x32xbf16>
    %5 = vector.shape_cast %4 : vector<1x8x32xbf16> to vector<8x32xbf16>
    %c0_2 = arith.constant 0 : index
    %c0_3 = arith.constant 0 : index
    %6 = vector.load %arg2[%c0_2, %c0_3] : memref<32x384xbf16, #tpu.memory_space<vmem>>, vector<32x384xbf16>
    %cst = arith.constant dense<0.000000e+00> : vector<8x384xf32>
    %7 = tpu.matmul %5, %6, %cst {dimension_numbers = #tpu.dot_dimension_numbers<[1], [0], [0], [1], [0, 0, 1, 1], [], []>} : vector<8x32xbf16>, vector<32x384xbf16>, vector<8x384xf32> -> vector<8x384xf32>
    %8 = vector.extract_strided_slice %7 {offsets = [0, 0], sizes = [8, 128], strides = [1, 1]} : vector<8x384xf32> to vector<8x128xf32>
    %9 = arith.truncf %8 : vector<8x128xf32> to vector<8x128xbf16>
    %10 = vector.extract_strided_slice %7 {offsets = [0, 128], sizes = [8, 128], strides = [1, 1]} : vector<8x384xf32> to vector<8x128xf32>
    %11 = arith.truncf %10 : vector<8x128xf32> to vector<8x128xbf16>
    %12 = vector.extract_strided_slice %7 {offsets = [0, 256], sizes = [8, 128], strides = [1, 1]} : vector<8x384xf32> to vector<8x128xf32>
    %13 = arith.truncf %12 : vector<8x128xf32> to vector<8x128xbf16>
    "tpu.trace_start"() <{level = 10 : i32, message = "th,sh->ts"}> : () -> ()
    %cst_4 = arith.constant dense<0.000000e+00> : vector<8x8xf32>
    %14 = tpu.matmul %9, %11, %cst_4 {dimension_numbers = #tpu.dot_dimension_numbers<[1], [1], [0], [0], [0, 0, 1, 0], [], []>} : vector<8x128xbf16>, vector<8x128xbf16>, vector<8x8xf32> -> vector<8x8xf32>
    %cst_5 = arith.constant 0xFF800000 : f32
    "tpu.trace_stop"() : () -> ()
    %15 = vector.broadcast %cst_5 : f32 to vector<8x8xf32>
    %16 = arith.select %2, %14, %15 : vector<8x8xi1>, vector<8x8xf32>
    %cst_6 = arith.constant dense<0xFF800000> : vector<8xf32>
    %17 = vector.multi_reduction <maximumf>, %16, %cst_6 [1] : vector<8x8xf32> to vector<8xf32>
    %18 = vector.shape_cast %17 : vector<8xf32> to vector<8x1xf32>
    %19 = vector.broadcast %18 : vector<8x1xf32> to vector<8x8xf32>
    %20 = arith.subf %16, %19 : vector<8x8xf32>
    %21 = math.exp %20 : vector<8x8xf32>
    %cst_7 = arith.constant dense<0.000000e+00> : vector<8xf32>
    %22 = vector.multi_reduction <add>, %21, %cst_7 [1] : vector<8x8xf32> to vector<8xf32>
    %23 = vector.shape_cast %22 : vector<8xf32> to vector<8x1xf32>
    %24 = arith.truncf %21 : vector<8x8xf32> to vector<8x8xbf16>
    %cst_8 = arith.constant dense<0.000000e+00> : vector<8x128xf32>
    %25 = tpu.matmul %24, %13, %cst_8 {dimension_numbers = #tpu.dot_dimension_numbers<[1], [0], [0], [1], [0, 0, 1, 1], [], []>} : vector<8x8xbf16>, vector<8x128xbf16>, vector<8x128xf32> -> vector<8x128xf32>
    %26 = tpu.reciprocal %23 {approx = true} : vector<8x1xf32> -> vector<8x1xf32>
    %27 = vector.broadcast %26 : vector<8x1xf32> to vector<8x128xf32>
    %28 = arith.mulf %25, %27 : vector<8x128xf32>
    %c0_9 = arith.constant 0 : index
    %c0_10 = arith.constant 0 : index
    %c0_11 = arith.constant 0 : index
    %29 = vector.load %arg3[%c0_9, %c0_10, %c0_11] : memref<1x8x128xf32, #tpu.memory_space<vmem>>, vector<1x8x128xf32>
    %30 = vector.shape_cast %29 : vector<1x8x128xf32> to vector<8x128xf32>
    %31 = vector.shape_cast %28 : vector<8x128xf32> to vector<1x8x128xf32>
    tpu.vector_store %arg3[%c0_9, %c0_10, %c0_11], %31 {strides = array<i32>} : memref<1x8x128xf32, #tpu.memory_space<vmem>>, vector<1x8x128xf32>,
    return
  }
  func.func @transform_0(%arg0: i32) -> (i32, i32, i32) {
    %c0_i32 = arith.constant 0 : i32
    %c0_i32_0 = arith.constant 0 : i32
    %c0_i32_1 = arith.constant 0 : i32
    return %arg0, %c0_i32, %c0_i32_0 : i32, i32, i32
  }
  func.func @transform_1(%arg0: i32) -> (i32, i32) {
    %c0_i32 = arith.constant 0 : i32
    %c0_i32_0 = arith.constant 0 : i32
    %c0_i32_1 = arith.constant 0 : i32
    return %c0_i32, %c0_i32_0 : i32, i32
  }
  func.func @transform_2(%arg0: i32) -> (i32, i32, i32) {
    %c0_i32 = arith.constant 0 : i32
    %c0_i32_0 = arith.constant 0 : i32
    %c0_i32_1 = arith.constant 0 : i32
    return %arg0, %c0_i32, %c0_i32_0 : i32, i32, i32
  }
}

module attributes {stable_mosaic.version = 11 : i64} {
  func.func @_head_kernel(%arg0: i32, %arg1: memref<1x8x32xf32, #tpu.memory_space<vmem>>, %arg2: memref<32x384xbf16, #tpu.memory_space<vmem>>, %arg3: memref<1x8x128xf32, #tpu.memory_space<vmem>>) attributes {dimension_semantics = [#tpu.dimension_semantics<parallel>], iteration_bounds = array<i64: 2>, scalar_prefetch = 0 : i64, scratch_operands = 0 : i64, tpu.core_type = #tpu.core_type<tc>, window_params = [{transform_indices = @transform_0, window_bounds = array<i64: 1, 8, 32>}, {pipeline_mode = #tpu.pipeline_mode<synchronous>, transform_indices = @transform_1, window_bounds = array<i64: 32, 384>}, {transform_indices = @transform_2, window_bounds = array<i64: 1, 8, 128>}]} {
    %0 = tpu.iota {dimensions = array<i32: 0>} : vector<8x8xi32>
    %1 = tpu.iota {dimensions = array<i32: 1>} : vector<8x8xi32>
    %2 = arith.cmpi sge, %0, %1 : vector<8x8xi32>
    %c0 = arith.constant 0 : index
    %c0_0 = arith.constant 0 : index
    %c0_1 = arith.constant 0 : index
    %3 = vector.load %arg1[%c0, %c0_0, %c0_1] : memref<1x8x32xf32, #tpu.memory_space<vmem>>, vector<1x8x32xf32>
    %4 = arith.truncf %3 : vector<1x8x32xf32> to vector<1x8x32xbf16>
    %5 = vector.shape_cast %4 : vector<1x8x32xbf16> to vector<8x32xbf16>
    %c0_2 = arith.constant 0 : index
    %c0_3 = arith.constant 0 : index
    %6 = vector.load %arg2[%c0_2, %c0_3] : memref<32x384xbf16, #tpu.memory_space<vmem>>, vector<32x384xbf16>
    %cst = arith.constant dense<0.000000e+00> : vector<8x384xf32>
    %7 = tpu.matmul %5, %6, %cst {dimension_numbers = #tpu.dot_dimension_numbers<[1], [0], [0], [1], [0, 0, 1, 1], [], []>} : vector<8x32xbf16>, vector<32x384xbf16>, vector<8x384xf32> -> vector<8x384xf32>
    %8 = vector.extract_strided_slice %7 {offsets = [0, 0], sizes = [8, 128], strides = [1, 1]} : vector<8x384xf32> to vector<8x128xf32>
    %9 = arith.truncf %8 : vector<8x128xf32> to vector<8x128xbf16>
    %10 = vector.extract_strided_slice %7 {offsets = [0, 128], sizes = [8, 128], strides = [1, 1]} : vector<8x384xf32> to vector<8x128xf32>
    %11 = arith.truncf %10 : vector<8x128xf32> to vector<8x128xbf16>
    %12 = vector.extract_strided_slice %7 {offsets = [0, 256], sizes = [8, 128], strides = [1, 1]} : vector<8x384xf32> to vector<8x128xf32>
    %13 = arith.truncf %12 : vector<8x128xf32> to vector<8x128xbf16>
    "tpu.trace_start"() <{level = 10 : i32, message = "th,sh->ts"}> : () -> ()
    %cst_4 = arith.constant dense<0.000000e+00> : vector<8x8xf32>
    %14 = tpu.matmul %9, %11, %cst_4 {dimension_numbers = #tpu.dot_dimension_numbers<[1], [1], [0], [0], [0, 0, 1, 0], [], []>} : vector<8x128xbf16>, vector<8x128xbf16>, vector<8x8xf32> -> vector<8x8xf32>
    %cst_5 = arith.constant 0xFF800000 : f32
    "tpu.trace_stop"() : () -> ()
    %15 = vector.broadcast %cst_5 : f32 to vector<8x8xf32>
    %16 = arith.select %2, %14, %15 : vector<8x8xi1>, vector<8x8xf32>
    %cst_6 = arith.constant dense<0xFF800000> : vector<8xf32>
    %17 = vector.multi_reduction <maximumf>, %16, %cst_6 [1] : vector<8x8xf32> to vector<8xf32>
    %18 = vector.shape_cast %17 : vector<8xf32> to vector<8x1xf32>
    %19 = vector.broadcast %18 : vector<8x1xf32> to vector<8x8xf32>
    %20 = arith.subf %16, %19 : vector<8x8xf32>
    %21 = math.exp %20 : vector<8x8xf32>
    %cst_7 = arith.constant dense<0.000000e+00> : vector<8xf32>
    %22 = vector.multi_reduction <add>, %21, %cst_7 [1] : vector<8x8xf32> to vector<8xf32>
    %23 = vector.shape_cast %22 : vector<8xf32> to vector<8x1xf32>
    %24 = arith.truncf %21 : vector<8x8xf32> to vector<8x8xbf16>
    %cst_8 = arith.constant dense<0.000000e+00> : vector<8x128xf32>
    %25 = tpu.matmul %24, %13, %cst_8 {dimension_numbers = #tpu.dot_dimension_numbers<[1], [0], [0], [1], [0, 0, 1, 1], [], []>} : vector<8x8xbf16>, vector<8x128xbf16>, vector<8x128xf32> -> vector<8x128xf32>
    %26 = tpu.reciprocal %23 {approx = true} : vector<8x1xf32> -> vector<8x1xf32>
    %27 = vector.broadcast %26 : vector<8x1xf32> to vector<8x128xf32>
    %28 = arith.mulf %25, %27 : vector<8x128xf32>
    %c0_9 = arith.constant 0 : index
    %c0_10 = arith.constant 0 : index
    %c0_11 = arith.constant 0 : index
    %29 = vector.load %arg3[%c0_9, %c0_10, %c0_11] : memref<1x8x128xf32, #tpu.memory_space<vmem>>, vector<1x8x128xf32>
    %30 = vector.shape_cast %29 : vector<1x8x128xf32> to vector<8x128xf32>
    %31 = vector.shape_cast %28 : vector<8x128xf32> to vector<1x8x128xf32>
    tpu.vector_store %arg3[%c0_9, %c0_10, %c0_11], %31 {strides = array<i32>} : memref<1x8x128xf32, #tpu.memory_space<vmem>>, vector<1x8x128xf32>,
    return
  }
  func.func @transform_0(%arg0: i32) -> (i32, i32, i32) {
    %c0_i32 = arith.constant 0 : i32
    %c0_i32_0 = arith.constant 0 : i32
    %c0_i32_1 = arith.constant 0 : i32
    return %arg0, %c0_i32, %c0_i32_0 : i32, i32, i32
  }
  func.func @transform_1(%arg0: i32) -> (i32, i32) {
    %c0_i32 = arith.constant 0 : i32
    %c0_i32_0 = arith.constant 0 : i32
    %c0_i32_1 = arith.constant 0 : i32
    return %c0_i32, %c0_i32_0 : i32, i32
  }
  func.func @transform_2(%arg0: i32) -> (i32, i32, i32) {
    %c0_i32 = arith.constant 0 : i32
    %c0_i32_0 = arith.constant 0 : i32
    %c0_i32_1 = arith.constant 0 : i32
    return %arg0, %c0_i32, %c0_i32_0 : i32, i32, i32
  }
}

</mosaic_0001>

<bundles_post_ra>
// kernel: tpu_custom_call.1
= control target key start
LH: loop header
LB: loop body
LE: loop exit
PB: predicated region body
PF: predicated region fallthrough
CT: control target
= control target key end

     0   :  { %7 = vsyncpa [#allocation3], 0  ;;  %s986_s0 = inlined_call_operand.hbm [shape: f32[2,8,32], index: 0, kind: input, shape index: {}]   ;;  %s987_s1 = inlined_call_operand.hbm [shape: bf16[32,384], index: 1, kind: input, shape index: {}]   ;;  %s988_s2 = inlined_call_operand.hbm [shape: f32[2,8,128], index: 2, kind: output, shape index: {}]  }
   0x1   :  { %9 = vsyncpa [#allocation3 + $0x1], 0 }
   0x2   :  { %10 = vsyncpa [#allocation6], 0 }
   0x3   :  { %11 = vsyncpa [#allocation4], 0 }
   0x4   :  { %13 = vsyncpa [#allocation4 + $0x1], 0  ;;  %s783_s9 = smov 0   ;;  %s785_s10 = smov 0  }
   0x5   :  { %s787_s11 = smov 0   ;;  %s789_s12 = smov 0  }
   0x6 LB: > { %s804_s13 = sadd.s32 4294967295, %s758_s12   ;;  %s506_s14 = sadd.s32 4294967294, %s758_s12   ;;  %s758_s12 = sphi %s789_s12, %s1008_s12   ;;  %s754_s11 = sphi %s787_s11, %s1007_s11   ;;  %s750_s10 = sphi %s785_s10, %s1006_s10   ;;  %s746_s9 = sphi %s783_s9, %s1005_s9  }
   0x7   : > { %p39_p0 = scmp.ne.s32.totalorder %s750_s10, %s746_s9  ;;  %p989_p1 = scmp.eq.s32.totalorder %s804_s13, 0 }
   0x8   : > { %p90_p3 = scmp.eq.s32.totalorder %s506_s14, 1  ;;  %p507_p5 = scmp.ge.s32.totalorder %s758_s12, 1 }
   0x9   : > { %p813_p4 = por %p989_p1, %p39_p0  ;;  %p97_p7 = scmp.lt.s32.totalorder %s758_s12, 3 }
   0xa   : > { %p818_p6 = por %p90_p3, %p39_p0  ;;  %s760_s18 = smov [#allocation5]  }
   0xb   : > { %s992_s15 = scalar_select %p813_p4, 1, 0 }
   0xc   : > { %s993_s16 = scalar_select %p818_p6, 1, 0 }
   0xd   : > { %p823_p8 = pnand %p507_p5, %p97_p7  ;;  %s109_s19 = sshll.u32 %s760_s18, 4  ;;  %s827_s19 = int_to_ptr.vmem [resolvable:$true] %s109_s19 }
   0xe   : > { %s839_s21 = sadd.s32 1, %s758_s12   ;;  %s26_s22 = sadd.s32 1, %s754_s11 }
   0xf   : > { %s994_s17 = scalar_select %p823_p8, 1, 0 }
  0x10   : > { %p564_p9 = pneg %p823_p8  ;;  %s23_s23 = ssub.s32 %s758_s12, %s839_s21 }
  0x11   : > { %s630_s26 = scalar_lea.hbm %s987_s1, 768 }
  0x12   : > { %p834_p11 = pnand %p564_p9, %p989_p1  ;;  %p631_p12 = scmp.ne.s32.totalorder %s987_s1, %s630_s26 }
  0x13   : > { %p637_p5 = scmp.lt.u32.totalorder %s630_s26, %s987_s1 }
  0x14   : > { %p632_p13 = pneg %p834_p11 }
  0x16   : > { %p633_p0 = pnand %p632_p13, %p631_p12 }
  0x18   : > { %p634_p3 = pneg %p633_p0 }
  0x1a   : > { %p639_p7 = pnand %p637_p5, %p634_p3 }
  0x1c   : > { %642 = shalt.err (!%p639_p7)
}
  0x1d   : > { %s643_s3 = scalar_lea.vmem %s827_s19, 768  ;;  %p651_p2 = scmp.lt.s32.totalorder %s827_s19, %s827_s19 }
  0x1e   : > { %p644_p9 = scmp.ne.s32.totalorder %s827_s19, %s643_s3  ;;  %p652_p6 = scmp.lt.s32.totalorder %s643_s3, %s643_s3 }
  0x20   : > { %p646_p10 = pnand %p644_p9, %p632_p13  ;;  %p653_p4 = por %p652_p6, %p651_p2 }
  0x22   : > { %p647_p1 = pneg %p646_p10 }
  0x24   : > { %p654_p8 = pnand %p653_p4, %p647_p1 }
  0x26   : > { %657 = shalt.err (!%p654_p8)
}
  0x27   : > { %s761_s4 = smov 192   ;;  %s762_s5 = smov 12  }
  0x28   : > { %567 = dma.hbm_to_vmem [thread:$0]  (!%p834_p11), %s987_s1, 768, %s827_s19, [#allocation6], %s761_s4, %s761_s4, %s762_s5  }
  0x29   : > { %p24_p2 = scmp.eq.s32.totalorder %s23_s23, 0  ;;  %p33_p1 = scmp.ne.s32.totalorder %s754_s11, %s750_s10 }
  0x2a   : > { %p34_p4 = scmp.eq.s32.totalorder %s758_s12, 0  ;;  %p577_p6 = scmp.lt.s32.totalorder %s758_s12, 2 }
  0x2b   : > { %s870_s8 = scalar_select %p24_p2, %s754_s11, %s26_s22  }
  0x2c   : > { %p35_p8 = por %p34_p4, %p33_p1  ;;  %p996_p10 = scmp.eq.s32.totalorder %s804_s13, 1 }
  0x2d   : > { %s123_s18 = sand.u32 1, %s754_s11   ;;  %s511_s24 = sshll.u32 %s758_s12, 7 }
  0x2e   : > { %p874_p12 = por %p996_p10, %p33_p1  ;;  %s510_s25 = sshll.u32 %s123_s18, 3 }
  0x2f   : > { %s883_s27 = scalar_lea.hbm %s986_s0, %s511_s24  ;;  %s127_s19 = scalar_lea.vmem [#allocation2], %s510_s25 }
  0x30   : > { %s134_s22 = sshll.u32 %s127_s19, 4  ;;  %p885_p11 = pnand %p577_p6, %p35_p8  ;;  %s889_s22 = int_to_ptr.vmem [resolvable:$true] %s134_s22 }
  0x31   : > { %s124_s28 = scalar_lea.sflag [#allocation3], %s123_s18  ;;  %s658_s29 = scalar_lea.hbm %s883_s27, 128 }
  0x32   : > { %p659_p13 = scmp.ne.s32.totalorder %s883_s27, %s658_s29  ;;  %p660_p0 = pneg %p885_p11 }
  0x33   : > { %s663_s4 = scalar_lea.hbm %s986_s0, 256  ;;  %p664_p7 = scmp.lt.u32.totalorder %s883_s27, %s986_s0 }
  0x34   : > { %p661_p3 = pnand %p660_p0, %p659_p13  ;;  %p665_p9 = scmp.lt.u32.totalorder %s663_s4, %s658_s29 }
  0x35   : > { %p667_p1 = scmp.lt.u32.totalorder %s658_s29, %s883_s27 }
  0x36   : > { %p662_p5 = pneg %p661_p3  ;;  %p666_p2 = por %p665_p9, %p664_p7 }
  0x38   : > { %p668_p4 = por %p667_p1, %p666_p2 }
  0x3a   : > { %p669_p6 = pnand %p668_p4, %p662_p5 }
  0x3c   : > { %672 = shalt.err (!%p669_p6)
}
  0x3d   : > { %s673_s7 = scalar_lea.vmem %s889_s22, 128  ;;  %s763_s18 = smov [#allocation2]  }
  0x3e   : > { %p674_p8 = scmp.ne.s32.totalorder %s889_s22, %s673_s7  ;;  %s678_s24 = sshll.u32 %s763_s18, 4  ;;  %s679_s24 = int_to_ptr.vmem [resolvable:$false] %s678_s24 }
  0x3f   : > { %s680_s25 = scalar_lea.vmem %s679_s24, 256  ;;  %p681_p3 = scmp.lt.s32.totalorder %s889_s22, %s679_s24 }
  0x40   : > { %p676_p10 = pnand %p674_p8, %p660_p0  ;;  %p682_p7 = scmp.lt.s32.totalorder %s680_s25, %s673_s7 }
  0x42   : > { %p677_p13 = pneg %p676_p10  ;;  %p683_p9 = por %p682_p7, %p681_p3 }
  0x44   : > { %p684_p2 = pnand %p683_p9, %p677_p13 }
  0x46   : > { %687 = shalt.err (!%p684_p2)
}
  0x47   : > { %571 = dma.hbm_to_vmem [thread:$0]  (!%p885_p11), %s883_s27, 128, %s889_s22, %s124_s28  }
  0x48   : > { %p999_p5 = scmp.ne.s32.totalorder %s994_s17, 0 }
  0x49   : > { %s919_s20 = sand.u32 (!%p999_p5), 1, %s750_s10   ;;  %p1000_p0 = scmp.ne.s32.totalorder (!%p999_p5), %s992_s15, 0 }
  0x4a   : > { %143 = sbr.rel (%p999_p5) target bundleno = 917 (0x395), region = 28  ;;  %s513_s26 = sshll.u32 (!%p999_p5), %s919_s20, 3 }
  0x4b   : > { %s146_s19 = scalar_lea.sflag (!%p999_p5), [#allocation3], %s919_s20  ;;  %s149_s29 = scalar_lea.vmem (!%p999_p5), [#allocation2], %s513_s26 }
  0x51   : > { %733 = dma.done.wait (%p1000_p0), %s146_s19, 128  }
  0x52   : > { %735 = vsyncadd (%p1000_p0), %s146_s19, 4294967168  ;;  %p1001_p11 = scmp.eq.s32.totalorder %s804_s13, 0 }
  0x54   : > { %737 = dma.done.wait (%p1001_p11), [#allocation6], 768   ;;  %p1002_p1 = pmov %p1001_p11 }
  0x55   : > { %v764_v0 = vmov 0   ;;  %v618_v1 = vld [vmem:[#allocation5 + $0x4] ss:$12 sps:$4 sm:$0xff]   ;;  %v620_v2 = vld [vmem:[#allocation5] ss:$12 sps:$4 sm:$0xff]   ;;  %vm222_vm0 = vcmask 261120   ;;  %v175_v16 = vlaneseq }
  0x56   : > { %739 = vsyncadd (%p1002_p1), [#allocation6], 4294966528  ;;  %258 = vmatprep.mubr.bf16.mxu0 %v764_v0  ;;  %226 = vmatprep.subr.bf16.mxu0 %v618_v1  ;;  %v621_v3 = vld [vmem:[#allocation5 + $0x1c] ss:$12 sps:$4 sm:$0xff]   ;;  %v623_v4 = vld [vmem:[#allocation5 + $0x18] ss:$12 sps:$4 sm:$0xff]  }
  0x57   : > { %v180_v5 = vld [vmem:[%s149_s29] sm:$0xff]  ;;  %227 = vmatpush1.bf16.msra.mxu0 %v620_v2  ;;  %v765_v7 = vmov 0.0   ;;  %vm766_vm1 = vmmov 0   ;;  %v625_v9 = vld [vmem:[#allocation5 + $0x20] ss:$12 sps:$4 sm:$0xff]   ;;  %v176_v17 = vshrl.u32 %v175_v16, 7 }
  0x58   : > { %228 = vmatprep.subr.bf16.mxu0 %v621_v3  ;;  %v181_v6 = vpack.c.bf16 %v180_v5, %v180_v5  ;;  %536 = vmatprep.subr.bf16.mxu1 %v765_v7  ;;  %v624_v8 = vld [vmem:[#allocation5 + $0x8] ss:$12 sps:$4 sm:$0xff]   ;;  %v178_v18 = vand.u32 127, %v175_v16  ;;  %vm351_vm3 = vcmask 64512   ;;  %vm365_vm4 = vcmask 1043456   ;;  %s526_s15 = sshll.u32 %s804_s13, 7 }
  0x59   : > { %540 = vmatprep.mubr.msk.bf16.mxu1 %vm766_vm1, %v765_v7  ;;  %537 = vmatpush3.bf16.msra.mxu1 %v624_v8  ;;  %s173_s17 = scalar_lea.vmem [#allocation7], %s513_s26  ;;  %s942_s28 = scalar_lea.hbm %s988_s2, %s526_s15 }
  0x5a   : > { %538 = vmatprep.subr.bf16.mxu1 %v765_v7  ;;  %vm179_vm2 = vcmp.ge.s32.totalorder %v176_v17, %v178_v18  ;;  %s426_s27 = sshll.u32 %s173_s17, 4  ;;  %s413_s13 = scalar_lea.sflag [#allocation4], %s919_s20  ;;  %s944_s27 = int_to_ptr.vmem [resolvable:$true] %s426_s27 }
  0x5b   : > { %229 = vmatpush1.bf16.msra.mxu0 %v623_v4  ;;  %s688_s30 = scalar_lea.vmem %s944_s27, 128  ;;  %s767_s3 = smov [#allocation7]  }
  0x5c   : > { %544 = vmatprep.subr.bf16.mxu0 %v765_v7  ;;  %p689_p4 = scmp.ne.s32.totalorder %s944_s27, %s688_s30  ;;  %s692_s4 = sshll.u32 %s767_s3, 4  ;;  %s693_s4 = int_to_ptr.vmem [resolvable:$false] %s692_s4 }
  0x5d   : > { %539 = vmatpush3.bf16.msra.mxu1 %v625_v9  ;;  %s694_s5 = scalar_lea.vmem %s693_s4, 256  ;;  %p695_p10 = scmp.lt.s32.totalorder %s944_s27, %s693_s4 }
  0x5e   : > { %522 = vmatmul.mubr.msk.bf16.vlgmr.msra.gmra.mrb[0].mxu0 %vm222_vm0, %v181_v6  ;;  %550 = vmatprep.subr.bf16.mxu1 %v765_v7  ;;  %p690_p6 = pnand %p689_p4, %p874_p12  ;;  %p696_p13 = scmp.lt.s32.totalorder %s694_s5, %s688_s30 }
  0x5f   : > { %546 = vmatprep.mubr.msk.bf16.mxu0 %vm766_vm1, %v765_v7 }
  0x60   : > { %541 = vmatmul.mubr.msk.bf16.vlgmr.msra.gmra.mrb[0].mxu1 %vm222_vm0, %v181_v6  ;;  %p691_p8 = pneg %p690_p6  ;;  %p697_p3 = por %p696_p13, %p695_p10 }
  0x61   : > { %552 = vmatprep.mubr.msk.bf16.mxu1 %vm766_vm1, %v765_v7 }
  0x62   : > { %p698_p7 = pnand %p697_p3, %p691_p8 }
 0x131   : > { %v260_v10 = vpop.f32.mrb[0].mxu0 }
 0x132   : > { %v262_v11 = vpop.f32.mrb[1].mxu0  ;;  %v307_v15 = vpack.c.bf16 %v260_v10, %v260_v10 }
 0x133   : > { %v308_v12 = vpack.c.bf16 %v262_v11, %v262_v11  ;;  %v264_v13 = vpop.f32.mrb[2].mxu0  ;;  %v301_v25 = vpop.f32.mrb[0].mxu1 }
 0x134   : > { %v265_v14 = vpop.f32.mrb[3].mxu0  ;;  %v309_v26 = vpack.c.bf16 %v301_v25, %v301_v25  ;;  %v542_v27 = vpop.f32.mrb[1].mxu1 }
 0x135   : > { %545 = vmatpush3.bf16.xpose.msra.mxu0 %v308_v12  ;;  %v304_v28 = vpop.f32.mrb[2].mxu1 }
 0x136   : > { %v367_v29 = vsel %vm365_vm4, %v309_v26, 0  ;;  %v543_v30 = vpop.f32.mrb[3].mxu1 }
 0x137   : > { %551 = vmatpush3.bf16.msra.mxu1 %v367_v29 }
 0x13c   : > { %547 = vmatmul.mubr.bf16.vlgmr.msra.gmra.mrb[4].mxu0 %v307_v15 }
 0x20f   : > { %v344_v19 = vpop.f32.mrb[4].mxu0 }
 0x210   : > { %v350_v20 = vsel %vm179_vm2, %v344_v19, -inf  ;;  %v548_v21 = vpop.f32.mrb[5].mxu0 }
 0x211   : > { %v347_v22 = vpop.f32.mrb[6].mxu0  ;;  %v352_v23 = vsel %vm351_vm3, %v350_v20, -inf }
 0x212   : > { %353 = vmax.xlane.f32.xlu0 %v352_v23  ;;  %v549_v24 = vpop.f32.mrb[7].mxu0 }
 0x29f   : > { %v354_v31 = vpop.xlane.xlu0 %353 }
 0x2a0   : > { %v355_v32 = vsub.f32 %v350_v20, %v354_v31 }
 0x2a2   : > { %v356_v33 = vmul.f32 1.442695, %v355_v32 }
 0x2a4   : > { %626 = vpow2.f32 %v356_v33 }
 0x2ae   : > { %v627_v34 = vpop.eup %626 }
 0x2af   : > { %v358_v35 = vsel %vm351_vm3, %v627_v34, 0.0  ;;  %v361_v36 = vpack.c.bf16 %v627_v34, %v627_v34 }
 0x2b0   : > { %359 = vadd.xlane.f32.xlu0 %v358_v35 }
 0x2b1   : > { %553 = vmatmul.mubr.msk.bf16.vlgmr.msra.gmra.mrb[4].mxu1 %vm351_vm3, %v361_v36 }
 0x33d   : > { %v360_v37 = vpop.xlane.xlu0 %359 }
 0x33e   : > { %628 = vrcp.f32 %v360_v37 }
 0x348   : > { %v629_v38 = vpop.eup %628 }
 0x384   : > { %v403_v39 = vpop.f32.mrb[4].mxu1 }
 0x385   : > { %v410_v40 = vmul.f32 %v629_v38, %v403_v39  ;;  %v554_v41 = vpop.f32.mrb[5].mxu1 }
 0x386   : > { %v406_v42 = vpop.f32.mrb[6].mxu1 }
 0x387   : > { %411 = vst [vmem:[%s173_s17] sm:$0xff] %v410_v40  ;;  %v555_v43 = vpop.f32.mrb[7].mxu1 }
 0x388   : > { %701 = shalt.err (!%p698_p7)
}
 0x389   : > { %s702_s6 = scalar_lea.hbm %s942_s28, 128  ;;  %s706_s24 = scalar_lea.hbm %s988_s2, 256 }
 0x38a   : > { %p703_p9 = scmp.ne.s32.totalorder %s942_s28, %s702_s6  ;;  %p707_p0 = scmp.lt.u32.totalorder %s942_s28, %s988_s2 }
 0x38b   : > { %p708_p11 = scmp.lt.u32.totalorder %s706_s24, %s702_s6  ;;  %p710_p4 = scmp.lt.u32.totalorder %s702_s6, %s942_s28 }
 0x38c   : > { %p704_p2 = pnand %p703_p9, %p874_p12 }
 0x38d   : > { %p709_p1 = por %p708_p11, %p707_p0 }
 0x38e   : > { %p705_p5 = pneg %p704_p2 }
 0x38f   : > { %p711_p6 = por %p710_p4, %p709_p1 }
 0x391   : > { %p712_p8 = pnand %p711_p6, %p705_p5 }
 0x393   : > { %715 = shalt.err (!%p712_p8)
}
 0x394   : > { %562 = dma.vmem_to_hbm [thread:$0]  (%p874_p12), %s944_s27, 128, %s942_s28, %s413_s13  }
 0x395 PF: > { %s438_s26 = sand.u32 1, %s746_s9   ;;  %p1003_p10 = scmp.ne.s32.totalorder %s993_s16, 0 }
 0x396   : > { %p1004_p13 = scmp.ge.s32.totalorder %s758_s12, 2  ;;  %s439_s19 = scalar_lea.sflag [#allocation4], %s438_s26 }
 0x398   : > { %p573_p3 = pnand %p1004_p13, %p1003_p10 }
 0x39a   : > { %741 = dma.done.wait (!%p573_p3), %s439_s19, 128  }
 0x39b   : > { %743 = vsyncadd (!%p573_p3), %s439_s19, 4294967168  ;;  %p16_p7 = scmp.ge.s32.totalorder %s839_s21, 4   ;;  %s1005_s9 = smov %s750_s10 }
 0x39c   : > { %s1006_s10 = smov %s754_s11  ;;  %s1007_s11 = smov %s870_s8 }
 0x39d   : > { %s1008_s12 = smov %s839_s21  ;;  %18 = sbr.rel (!%p16_p7) target bundleno = 6 (0x6), region = 77 }
 0x3a4   :  { %444 = vsyncpa [#allocation3], 1 }
 0x3a5   :  { %446 = vsyncpa [#allocation3 + $0x1], 1 }
 0x3a6   :  { %447 = vsyncpa [#allocation6], 1 }
 0x3a7   :  { %448 = vsyncpa [#allocation4], 1 }
 0x3a8   :  { %450 = vsyncpa [#allocation4 + $0x1], 1 }

// kernel: tpu_custom_call.1
= control target key start
LH: loop header
LB: loop body
LE: loop exit
PB: predicated region body
PF: predicated region fallthrough
CT: control target
= control target key end

     0   :  { %7 = vsyncpa [#allocation3], 0  ;;  %s986_s0 = inlined_call_operand.hbm [shape: f32[2,8,32], index: 0, kind: input, shape index: {}]   ;;  %s987_s1 = inlined_call_operand.hbm [shape: bf16[32,384], index: 1, kind: input, shape index: {}]   ;;  %s988_s2 = inlined_call_operand.hbm [shape: f32[2,8,128], index: 2, kind: output, shape index: {}]  }
   0x1   :  { %9 = vsyncpa [#allocation3 + $0x1], 0 }
   0x2   :  { %10 = vsyncpa [#allocation6], 0 }
   0x3   :  { %11 = vsyncpa [#allocation4], 0 }
   0x4   :  { %13 = vsyncpa [#allocation4 + $0x1], 0  ;;  %s783_s9 = smov 0   ;;  %s785_s10 = smov 0  }
   0x5   :  { %s787_s11 = smov 0   ;;  %s789_s12 = smov 0  }
   0x6 LB: > { %s804_s13 = sadd.s32 4294967295, %s758_s12   ;;  %s506_s14 = sadd.s32 4294967294, %s758_s12   ;;  %s758_s12 = sphi %s789_s12, %s1008_s12   ;;  %s754_s11 = sphi %s787_s11, %s1007_s11   ;;  %s750_s10 = sphi %s785_s10, %s1006_s10   ;;  %s746_s9 = sphi %s783_s9, %s1005_s9  }
   0x7   : > { %p39_p0 = scmp.ne.s32.totalorder %s750_s10, %s746_s9  ;;  %p989_p1 = scmp.eq.s32.totalorder %s804_s13, 0 }
   0x8   : > { %p90_p3 = scmp.eq.s32.totalorder %s506_s14, 1  ;;  %p507_p5 = scmp.ge.s32.totalorder %s758_s12, 1 }
   0x9   : > { %p813_p4 = por %p989_p1, %p39_p0  ;;  %p97_p7 = scmp.lt.s32.totalorder %s758_s12, 3 }
   0xa   : > { %p818_p6 = por %p90_p3, %p39_p0  ;;  %s760_s18 = smov [#allocation5]  }
   0xb   : > { %s992_s15 = scalar_select %p813_p4, 1, 0 }
   0xc   : > { %s993_s16 = scalar_select %p818_p6, 1, 0 }
   0xd   : > { %p823_p8 = pnand %p507_p5, %p97_p7  ;;  %s109_s19 = sshll.u32 %s760_s18, 4  ;;  %s827_s19 = int_to_ptr.vmem [resolvable:$true] %s109_s19 }
   0xe   : > { %s839_s21 = sadd.s32 1, %s758_s12   ;;  %s26_s22 = sadd.s32 1, %s754_s11 }
   0xf   : > { %s994_s17 = scalar_select %p823_p8, 1, 0 }
  0x10   : > { %p564_p9 = pneg %p823_p8  ;;  %s23_s23 = ssub.s32 %s758_s12, %s839_s21 }
  0x11   : > { %s630_s26 = scalar_lea.hbm %s987_s1, 768 }
  0x12   : > { %p834_p11 = pnand %p564_p9, %p989_p1  ;;  %p631_p12 = scmp.ne.s32.totalorder %s987_s1, %s630_s26 }
  0x13   : > { %p637_p5 = scmp.lt.u32.totalorder %s630_s26, %s987_s1 }
  0x14   : > { %p632_p13 = pneg %p834_p11 }
  0x16   : > { %p633_p0 = pnand %p632_p13, %p631_p12 }
  0x18   : > { %p634_p3 = pneg %p633_p0 }
  0x1a   : > { %p639_p7 = pnand %p637_p5, %p634_p3 }
  0x1c   : > { %642 = shalt.err (!%p639_p7)
}
  0x1d   : > { %s643_s3 = scalar_lea.vmem %s827_s19, 768  ;;  %p651_p2 = scmp.lt.s32.totalorder %s827_s19, %s827_s19 }
  0x1e   : > { %p644_p9 = scmp.ne.s32.totalorder %s827_s19, %s643_s3  ;;  %p652_p6 = scmp.lt.s32.totalorder %s643_s3, %s643_s3 }
  0x20   : > { %p646_p10 = pnand %p644_p9, %p632_p13  ;;  %p653_p4 = por %p652_p6, %p651_p2 }
  0x22   : > { %p647_p1 = pneg %p646_p10 }
  0x24   : > { %p654_p8 = pnand %p653_p4, %p647_p1 }
  0x26   : > { %657 = shalt.err (!%p654_p8)
}
  0x27   : > { %s761_s4 = smov 192   ;;  %s762_s5 = smov 12  }
  0x28   : > { %567 = dma.hbm_to_vmem [thread:$0]  (!%p834_p11), %s987_s1, 768, %s827_s19, [#allocation6], %s761_s4, %s761_s4, %s762_s5  }
  0x29   : > { %p24_p2 = scmp.eq.s32.totalorder %s23_s23, 0  ;;  %p33_p1 = scmp.ne.s32.totalorder %s754_s11, %s750_s10 }
  0x2a   : > { %p34_p4 = scmp.eq.s32.totalorder %s758_s12, 0  ;;  %p577_p6 = scmp.lt.s32.totalorder %s758_s12, 2 }
  0x2b   : > { %s870_s8 = scalar_select %p24_p2, %s754_s11, %s26_s22  }
  0x2c   : > { %p35_p8 = por %p34_p4, %p33_p1  ;;  %p996_p10 = scmp.eq.s32.totalorder %s804_s13, 1 }
  0x2d   : > { %s123_s18 = sand.u32 1, %s754_s11   ;;  %s511_s24 = sshll.u32 %s758_s12, 7 }
  0x2e   : > { %p874_p12 = por %p996_p10, %p33_p1  ;;  %s510_s25 = sshll.u32 %s123_s18, 3 }
  0x2f   : > { %s883_s27 = scalar_lea.hbm %s986_s0, %s511_s24  ;;  %s127_s19 = scalar_lea.vmem [#allocation2], %s510_s25 }
  0x30   : > { %s134_s22 = sshll.u32 %s127_s19, 4  ;;  %p885_p11 = pnand %p577_p6, %p35_p8  ;;  %s889_s22 = int_to_ptr.vmem [resolvable:$true] %s134_s22 }
  0x31   : > { %s124_s28 = scalar_lea.sflag [#allocation3], %s123_s18  ;;  %s658_s29 = scalar_lea.hbm %s883_s27, 128 }
  0x32   : > { %p659_p13 = scmp.ne.s32.totalorder %s883_s27, %s658_s29  ;;  %p660_p0 = pneg %p885_p11 }
  0x33   : > { %s663_s4 = scalar_lea.hbm %s986_s0, 256  ;;  %p664_p7 = scmp.lt.u32.totalorder %s883_s27, %s986_s0 }
  0x34   : > { %p661_p3 = pnand %p660_p0, %p659_p13  ;;  %p665_p9 = scmp.lt.u32.totalorder %s663_s4, %s658_s29 }
  0x35   : > { %p667_p1 = scmp.lt.u32.totalorder %s658_s29, %s883_s27 }
  0x36   : > { %p662_p5 = pneg %p661_p3  ;;  %p666_p2 = por %p665_p9, %p664_p7 }
  0x38   : > { %p668_p4 = por %p667_p1, %p666_p2 }
  0x3a   : > { %p669_p6 = pnand %p668_p4, %p662_p5 }
  0x3c   : > { %672 = shalt.err (!%p669_p6)
}
  0x3d   : > { %s673_s7 = scalar_lea.vmem %s889_s22, 128  ;;  %s763_s18 = smov [#allocation2]  }
  0x3e   : > { %p674_p8 = scmp.ne.s32.totalorder %s889_s22, %s673_s7  ;;  %s678_s24 = sshll.u32 %s763_s18, 4  ;;  %s679_s24 = int_to_ptr.vmem [resolvable:$false] %s678_s24 }
  0x3f   : > { %s680_s25 = scalar_lea.vmem %s679_s24, 256  ;;  %p681_p3 = scmp.lt.s32.totalorder %s889_s22, %s679_s24 }
  0x40   : > { %p676_p10 = pnand %p674_p8, %p660_p0  ;;  %p682_p7 = scmp.lt.s32.totalorder %s680_s25, %s673_s7 }
  0x42   : > { %p677_p13 = pneg %p676_p10  ;;  %p683_p9 = por %p682_p7, %p681_p3 }
  0x44   : > { %p684_p2 = pnand %p683_p9, %p677_p13 }
  0x46   : > { %687 = shalt.err (!%p684_p2)
}
  0x47   : > { %571 = dma.hbm_to_vmem [thread:$0]  (!%p885_p11), %s883_s27, 128, %s889_s22, %s124_s28  }
  0x48   : > { %p999_p5 = scmp.ne.s32.totalorder %s994_s17, 0 }
  0x49   : > { %s919_s20 = sand.u32 (!%p999_p5), 1, %s750_s10   ;;  %p1000_p0 = scmp.ne.s32.totalorder (!%p999_p5), %s992_s15, 0 }
  0x4a   : > { %143 = sbr.rel (%p999_p5) target bundleno = 917 (0x395), region = 28  ;;  %s513_s26 = sshll.u32 (!%p999_p5), %s919_s20, 3 }
  0x4b   : > { %s146_s19 = scalar_lea.sflag (!%p999_p5), [#allocation3], %s919_s20  ;;  %s149_s29 = scalar_lea.vmem (!%p999_p5), [#allocation2], %s513_s26 }
  0x51   : > { %733 = dma.done.wait (%p1000_p0), %s146_s19, 128  }
  0x52   : > { %735 = vsyncadd (%p1000_p0), %s146_s19, 4294967168  ;;  %p1001_p11 = scmp.eq.s32.totalorder %s804_s13, 0 }
  0x54   : > { %737 = dma.done.wait (%p1001_p11), [#allocation6], 768   ;;  %p1002_p1 = pmov %p1001_p11 }
  0x55   : > { %v764_v0 = vmov 0   ;;  %v618_v1 = vld [vmem:[#allocation5 + $0x4] ss:$12 sps:$4 sm:$0xff]   ;;  %v620_v2 = vld [vmem:[#allocation5] ss:$12 sps:$4 sm:$0xff]   ;;  %vm222_vm0 = vcmask 261120   ;;  %v175_v16 = vlaneseq }
  0x56   : > { %739 = vsyncadd (%p1002_p1), [#allocation6], 4294966528  ;;  %258 = vmatprep.mubr.bf16.mxu0 %v764_v0  ;;  %226 = vmatprep.subr.bf16.mxu0 %v618_v1  ;;  %v621_v3 = vld [vmem:[#allocation5 + $0x1c] ss:$12 sps:$4 sm:$0xff]   ;;  %v623_v4 = vld [vmem:[#allocation5 + $0x18] ss:$12 sps:$4 sm:$0xff]  }
  0x57   : > { %v180_v5 = vld [vmem:[%s149_s29] sm:$0xff]  ;;  %227 = vmatpush1.bf16.msra.mxu0 %v620_v2  ;;  %v765_v7 = vmov 0.0   ;;  %vm766_vm1 = vmmov 0   ;;  %v625_v9 = vld [vmem:[#allocation5 + $0x20] ss:$12 sps:$4 sm:$0xff]   ;;  %v176_v17 = vshrl.u32 %v175_v16, 7 }
  0x58   : > { %228 = vmatprep.subr.bf16.mxu0 %v621_v3  ;;  %v181_v6 = vpack.c.bf16 %v180_v5, %v180_v5  ;;  %536 = vmatprep.subr.bf16.mxu1 %v765_v7  ;;  %v624_v8 = vld [vmem:[#allocation5 + $0x8] ss:$12 sps:$4 sm:$0xff]   ;;  %v178_v18 = vand.u32 127, %v175_v16  ;;  %vm351_vm3 = vcmask 64512   ;;  %vm365_vm4 = vcmask 1043456   ;;  %s526_s15 = sshll.u32 %s804_s13, 7 }
  0x59   : > { %540 = vmatprep.mubr.msk.bf16.mxu1 %vm766_vm1, %v765_v7  ;;  %537 = vmatpush3.bf16.msra.mxu1 %v624_v8  ;;  %s173_s17 = scalar_lea.vmem [#allocation7], %s513_s26  ;;  %s942_s28 = scalar_lea.hbm %s988_s2, %s526_s15 }
  0x5a   : > { %538 = vmatprep.subr.bf16.mxu1 %v765_v7  ;;  %vm179_vm2 = vcmp.ge.s32.totalorder %v176_v17, %v178_v18  ;;  %s426_s27 = sshll.u32 %s173_s17, 4  ;;  %s413_s13 = scalar_lea.sflag [#allocation4], %s919_s20  ;;  %s944_s27 = int_to_ptr.vmem [resolvable:$true] %s426_s27 }
  0x5b   : > { %229 = vmatpush1.bf16.msra.mxu0 %v623_v4  ;;  %s688_s30 = scalar_lea.vmem %s944_s27, 128  ;;  %s767_s3 = smov [#allocation7]  }
  0x5c   : > { %544 = vmatprep.subr.bf16.mxu0 %v765_v7  ;;  %p689_p4 = scmp.ne.s32.totalorder %s944_s27, %s688_s30  ;;  %s692_s4 = sshll.u32 %s767_s3, 4  ;;  %s693_s4 = int_to_ptr.vmem [resolvable:$false] %s692_s4 }
  0x5d   : > { %539 = vmatpush3.bf16.msra.mxu1 %v625_v9  ;;  %s694_s5 = scalar_lea.vmem %s693_s4, 256  ;;  %p695_p10 = scmp.lt.s32.totalorder %s944_s27, %s693_s4 }
  0x5e   : > { %522 = vmatmul.mubr.msk.bf16.vlgmr.msra.gmra.mrb[0].mxu0 %vm222_vm0, %v181_v6  ;;  %550 = vmatprep.subr.bf16.mxu1 %v765_v7  ;;  %p690_p6 = pnand %p689_p4, %p874_p12  ;;  %p696_p13 = scmp.lt.s32.totalorder %s694_s5, %s688_s30 }
  0x5f   : > { %546 = vmatprep.mubr.msk.bf16.mxu0 %vm766_vm1, %v765_v7 }
  0x60   : > { %541 = vmatmul.mubr.msk.bf16.vlgmr.msra.gmra.mrb[0].mxu1 %vm222_vm0, %v181_v6  ;;  %p691_p8 = pneg %p690_p6  ;;  %p697_p3 = por %p696_p13, %p695_p10 }
  0x61   : > { %552 = vmatprep.mubr.msk.bf16.mxu1 %vm766_vm1, %v765_v7 }
  0x62   : > { %p698_p7 = pnand %p697_p3, %p691_p8 }
 0x131   : > { %v260_v10 = vpop.f32.mrb[0].mxu0 }
 0x132   : > { %v262_v11 = vpop.f32.mrb[1].mxu0  ;;  %v307_v15 = vpack.c.bf16 %v260_v10, %v260_v10 }
 0x133   : > { %v308_v12 = vpack.c.bf16 %v262_v11, %v262_v11  ;;  %v264_v13 = vpop.f32.mrb[2].mxu0  ;;  %v301_v25 = vpop.f32.mrb[0].mxu1 }
 0x134   : > { %v265_v14 = vpop.f32.mrb[3].mxu0  ;;  %v309_v26 = vpack.c.bf16 %v301_v25, %v301_v25  ;;  %v542_v27 = vpop.f32.mrb[1].mxu1 }
 0x135   : > { %545 = vmatpush3.bf16.xpose.msra.mxu0 %v308_v12  ;;  %v304_v28 = vpop.f32.mrb[2].mxu1 }
 0x136   : > { %v367_v29 = vsel %vm365_vm4, %v309_v26, 0  ;;  %v543_v30 = vpop.f32.mrb[3].mxu1 }
 0x137   : > { %551 = vmatpush3.bf16.msra.mxu1 %v367_v29 }
 0x13c   : > { %547 = vmatmul.mubr.bf16.vlgmr.msra.gmra.mrb[4].mxu0 %v307_v15 }
 0x20f   : > { %v344_v19 = vpop.f32.mrb[4].mxu0 }
 0x210   : > { %v350_v20 = vsel %vm179_vm2, %v344_v19, -inf  ;;  %v548_v21 = vpop.f32.mrb[5].mxu0 }
 0x211   : > { %v347_v22 = vpop.f32.mrb[6].mxu0  ;;  %v352_v23 = vsel %vm351_vm3, %v350_v20, -inf }
 0x212   : > { %353 = vmax.xlane.f32.xlu0 %v352_v23  ;;  %v549_v24 = vpop.f32.mrb[7].mxu0 }
 0x29f   : > { %v354_v31 = vpop.xlane.xlu0 %353 }
 0x2a0   : > { %v355_v32 = vsub.f32 %v350_v20, %v354_v31 }
 0x2a2   : > { %v356_v33 = vmul.f32 1.442695, %v355_v32 }
 0x2a4   : > { %626 = vpow2.f32 %v356_v33 }
 0x2ae   : > { %v627_v34 = vpop.eup %626 }
 0x2af   : > { %v358_v35 = vsel %vm351_vm3, %v627_v34, 0.0  ;;  %v361_v36 = vpack.c.bf16 %v627_v34, %v627_v34 }
 0x2b0   : > { %359 = vadd.xlane.f32.xlu0 %v358_v35 }
 0x2b1   : > { %553 = vmatmul.mubr.msk.bf16.vlgmr.msra.gmra.mrb[4].mxu1 %vm351_vm3, %v361_v36 }
 0x33d   : > { %v360_v37 = vpop.xlane.xlu0 %359 }
 0x33e   : > { %628 = vrcp.f32 %v360_v37 }
 0x348   : > { %v629_v38 = vpop.eup %628 }
 0x384   : > { %v403_v39 = vpop.f32.mrb[4].mxu1 }
 0x385   : > { %v410_v40 = vmul.f32 %v629_v38, %v403_v39  ;;  %v554_v41 = vpop.f32.mrb[5].mxu1 }
 0x386   : > { %v406_v42 = vpop.f32.mrb[6].mxu1 }
 0x387   : > { %411 = vst [vmem:[%s173_s17] sm:$0xff] %v410_v40  ;;  %v555_v43 = vpop.f32.mrb[7].mxu1 }
 0x388   : > { %701 = shalt.err (!%p698_p7)
}
 0x389   : > { %s702_s6 = scalar_lea.hbm %s942_s28, 128  ;;  %s706_s24 = scalar_lea.hbm %s988_s2, 256 }
 0x38a   : > { %p703_p9 = scmp.ne.s32.totalorder %s942_s28, %s702_s6  ;;  %p707_p0 = scmp.lt.u32.totalorder %s942_s28, %s988_s2 }
 0x38b   : > { %p708_p11 = scmp.lt.u32.totalorder %s706_s24, %s702_s6  ;;  %p710_p4 = scmp.lt.u32.totalorder %s702_s6, %s942_s28 }
 0x38c   : > { %p704_p2 = pnand %p703_p9, %p874_p12 }
 0x38d   : > { %p709_p1 = por %p708_p11, %p707_p0 }
 0x38e   : > { %p705_p5 = pneg %p704_p2 }
 0x38f   : > { %p711_p6 = por %p710_p4, %p709_p1 }
 0x391   : > { %p712_p8 = pnand %p711_p6, %p705_p5 }
 0x393   : > { %715 = shalt.err (!%p712_p8)
}
 0x394   : > { %562 = dma.vmem_to_hbm [thread:$0]  (%p874_p12), %s944_s27, 128, %s942_s28, %s413_s13  }
 0x395 PF: > { %s438_s26 = sand.u32 1, %s746_s9   ;;  %p1003_p10 = scmp.ne.s32.totalorder %s993_s16, 0 }
 0x396   : > { %p1004_p13 = scmp.ge.s32.totalorder %s758_s12, 2  ;;  %s439_s19 = scalar_lea.sflag [#allocation4], %s438_s26 }
 0x398   : > { %p573_p3 = pnand %p1004_p13, %p1003_p10 }
 0x39a   : > { %741 = dma.done.wait (!%p573_p3), %s439_s19, 128  }
 0x39b   : > { %743 = vsyncadd (!%p573_p3), %s439_s19, 4294967168  ;;  %p16_p7 = scmp.ge.s32.totalorder %s839_s21, 4   ;;  %s1005_s9 = smov %s750_s10 }
 0x39c   : > { %s1006_s10 = smov %s754_s11  ;;  %s1007_s11 = smov %s870_s8 }
 0x39d   : > { %s1008_s12 = smov %s839_s21  ;;  %18 = sbr.rel (!%p16_p7) target bundleno = 6 (0x6), region = 77 }
 0x3a4   :  { %444 = vsyncpa [#allocation3], 1 }
 0x3a5   :  { %446 = vsyncpa [#allocation3 + $0x1], 1 }
 0x3a6   :  { %447 = vsyncpa [#allocation6], 1 }
 0x3a7   :  { %448 = vsyncpa [#allocation4], 1 }
 0x3a8   :  { %450 = vsyncpa [#allocation4 + $0x1], 1 }

</bundles_post_ra>
